<compile_context>
chip_gen: v7x
topology: tpu7x:2x2x1
jax: 0.10.0
libtpu: 0.0.40
codegen_flags: <defaults>
</compile_context>

<pallas_src>
import math

import jax
import jax.numpy as jnp
from jax.experimental import pallas as pl
from jax.experimental.pallas import tpu as pltpu

_LANE = 128


def _round_up(n, m):
    return ((n + m - 1) // m) * m


def mlp_mushroom_kernel(x_ref,
                        w1_ref, b1_ref,
                        w2_ref, b2_ref,
                        w3_ref, b3_ref,
                        w4_ref, b4_ref,
                        o_ref):
    # Layer 1: Linear + ReLU  (bf16 operands, f32 accumulation)
    h1 = jnp.dot(x_ref[...], w1_ref[...],
                 preferred_element_type=jnp.float32) + b1_ref[...]
    h1 = jnp.maximum(h1, 0.0).astype(jnp.bfloat16)

    # Layer 2: Linear + ReLU
    h2 = jnp.dot(h1, w2_ref[...],
                 preferred_element_type=jnp.float32) + b2_ref[...]
    h2 = jnp.maximum(h2, 0.0).astype(jnp.bfloat16)

    # Layer 3: Linear + ReLU
    h3 = jnp.dot(h2, w3_ref[...],
                 preferred_element_type=jnp.float32) + b3_ref[...]
    h3 = jnp.maximum(h3, 0.0).astype(jnp.bfloat16)

    # Layer 4: Linear + Sigmoid (output lanes zero-padded to 128 -> dense store)
    z4 = jnp.dot(h3, w4_ref[...],
                 preferred_element_type=jnp.float32) + b4_ref[...]
    # sigmoid(z) = 1 / (1 + exp(-z)); exp and approx-recip both run on the EUP.
    o_ref[...] = pl.reciprocal(1.0 + jnp.exp(-z4), approx=True)


def mlp_mushroom_forward(x, params, *, tile_b=512):
    """x: (B, D_in) f32.  params: dict of (W, b) per layer in PyTorch layout."""
    (w1, b1), (w2, b2), (w3, b3), (w4, b4) = (
        params["linear1"], params["linear2"], params["linear3"], params["linear4"])

    B, D_in = x.shape
    D_out = w4.shape[0]                       # PyTorch layout: (out, in)
    n_pad = _round_up(D_out, _LANE)           # lane-dense output width

    # Glue: transpose PyTorch (out, in) weights to (in, out), cast to bf16.
    w1t = w1.T.astype(jnp.bfloat16)
    w2t = w2.T.astype(jnp.bfloat16)
    w3t = w3.T.astype(jnp.bfloat16)
    w4t = jnp.zeros((w4.shape[1], n_pad), jnp.bfloat16).at[:, :D_out].set(
        w4.T.astype(jnp.bfloat16))
    # Biases stay f32 as (1, N); the in-kernel add broadcasts for free on the VPU.
    b1r = b1.reshape(1, -1).astype(jnp.float32)
    b2r = b2.reshape(1, -1).astype(jnp.float32)
    b3r = b3.reshape(1, -1).astype(jnp.float32)
    b4r = jnp.zeros((1, n_pad), jnp.float32).at[:, :D_out].set(
        b4.reshape(1, -1).astype(jnp.float32))

    # Batch tiling: pad B to a multiple of 16 (bf16 sublane packing), then to a
    # multiple of the tile so the grid covers it exactly.
    b16 = _round_up(B, 16)
    tb = min(tile_b, b16)
    b_pad = _round_up(b16, tb)

    x_bf = x.astype(jnp.bfloat16)
    if b_pad != B:
        x_bf = jnp.pad(x_bf, ((0, b_pad - B), (0, 0)))

    grid = (b_pad // tb,)

    resident = lambda a: pl.BlockSpec(a.shape, lambda i: (0,) * a.ndim)

    out = pl.pallas_call(
        mlp_mushroom_kernel,
        out_shape=jax.ShapeDtypeStruct((b_pad, n_pad), jnp.float32),
        grid=grid,
        in_specs=[pl.BlockSpec((tb, D_in), lambda i: (i, 0)),
                  resident(w1t), resident(b1r),
                  resident(w2t), resident(b2r),
                  resident(w3t), resident(b3r),
                  resident(w4t), resident(b4r)],
        out_specs=pl.BlockSpec((tb, n_pad), lambda i: (i, 0)),
        compiler_params=pltpu.CompilerParams(
            dimension_semantics=("parallel",)),
    )(x_bf, w1t, b1r, w2t, b2r, w3t, b3r, w4t, b4r)

    return out[:B, :D_out]


def init_linear(key, in_features, out_features):
    """Deterministic init mimicking nn.Linear's U(-1/sqrt(in), 1/sqrt(in))."""
    kw, kb = jax.random.split(key)
    bound = 1.0 / math.sqrt(in_features)
    w = jax.random.uniform(kw, (out_features, in_features), jnp.float32,
                           minval=-bound, maxval=bound)
    b = jax.random.uniform(kb, (out_features,), jnp.float32,
                           minval=-bound, maxval=bound)
    return w, b


def reference_forward(x, params):
    (w1, b1), (w2, b2), (w3, b3), (w4, b4) = (
        params["linear1"], params["linear2"], params["linear3"], params["linear4"])
    h1 = jax.nn.relu(x @ w1.T + b1)
    h2 = jax.nn.relu(h1 @ w2.T + b2)
    h3 = jax.nn.relu(h2 @ w3.T + b3)
    return jax.nn.sigmoid(h3 @ w4.T + b4)


if __name__ == "__main__":
    # Small shapes consistent with the module: D_in=32, H1=64, H2=32, H3=16, D_out=2
    B, D_in, H1, H2, H3, D_out = 8, 32, 64, 32, 16, 2

    key = jax.random.PRNGKey(0)
    kx, k1, k2, k3, k4 = jax.random.split(key, 5)

    x = jax.random.normal(kx, (B, D_in), jnp.float32)
    params = {
        "linear1": init_linear(k1, D_in, H1),
        "linear2": init_linear(k2, H1, H2),
        "linear3": init_linear(k3, H2, H3),
        "linear4": init_linear(k4, H3, D_out),
    }

    y = mlp_mushroom_forward(x, params)
    y = jax.block_until_ready(y)

    y_ref = reference_forward(x, params)
    assert y.shape == (B, D_out), y.shape
    # bf16 matmul operands + approx reciprocal -> compare with a loose tolerance
    # against the f32 reference (outputs are sigmoids in [0, 1]).
    assert jnp.allclose(y, y_ref, atol=2e-2, rtol=0.0), "mismatch vs reference"

    print("KERNEL_OK")
</pallas_src>

<mosaic_0001>
module attributes {stable_mosaic.version = 11 : i64} {
  func.func @mlp_mushroom_kernel(%arg0: i32, %arg1: memref<16x32xbf16, #tpu.memory_space<vmem>>, %arg2: memref<32x64xbf16, #tpu.memory_space<vmem>>, %arg3: memref<1x64xf32, #tpu.memory_space<vmem>>, %arg4: memref<64x32xbf16, #tpu.memory_space<vmem>>, %arg5: memref<1x32xf32, #tpu.memory_space<vmem>>, %arg6: memref<32x16xbf16, #tpu.memory_space<vmem>>, %arg7: memref<1x16xf32, #tpu.memory_space<vmem>>, %arg8: memref<16x128xbf16, #tpu.memory_space<vmem>>, %arg9: memref<1x128xf32, #tpu.memory_space<vmem>>, %arg10: memref<16x128xf32, #tpu.memory_space<vmem>>) attributes {dimension_semantics = [#tpu.dimension_semantics<parallel>], iteration_bounds = array<i64: 1>, scalar_prefetch = 0 : i64, scratch_operands = 0 : i64, tpu.core_type = #tpu.core_type<tc>, window_params = [{transform_indices = @transform_0, window_bounds = array<i64: 16, 32>}, {pipeline_mode = #tpu.pipeline_mode<synchronous>, transform_indices = @transform_1, window_bounds = array<i64: 32, 64>}, {pipeline_mode = #tpu.pipeline_mode<synchronous>, transform_indices = @transform_2, window_bounds = array<i64: 1, 64>}, {pipeline_mode = #tpu.pipeline_mode<synchronous>, transform_indices = @transform_3, window_bounds = array<i64: 64, 32>}, {pipeline_mode = #tpu.pipeline_mode<synchronous>, transform_indices = @transform_4, window_bounds = array<i64: 1, 32>}, {pipeline_mode = #tpu.pipeline_mode<synchronous>, transform_indices = @transform_5, window_bounds = array<i64: 32, 16>}, {pipeline_mode = #tpu.pipeline_mode<synchronous>, transform_indices = @transform_6, window_bounds = array<i64: 1, 16>}, {pipeline_mode = #tpu.pipeline_mode<synchronous>, transform_indices = @transform_7, window_bounds = array<i64: 16, 128>}, {pipeline_mode = #tpu.pipeline_mode<synchronous>, transform_indices = @transform_8, window_bounds = array<i64: 1, 128>}, {transform_indices = @transform_9, window_bounds = array<i64: 16, 128>}]} {
    %c0 = arith.constant 0 : index
    %c0_0 = arith.constant 0 : index
    %0 = vector.load %arg1[%c0, %c0_0] : memref<16x32xbf16, #tpu.memory_space<vmem>>, vector<16x32xbf16>
    %c0_1 = arith.constant 0 : index
    %c0_2 = arith.constant 0 : index
    %1 = vector.load %arg2[%c0_1, %c0_2] : memref<32x64xbf16, #tpu.memory_space<vmem>>, vector<32x64xbf16>
    %cst = arith.constant dense<0.000000e+00> : vector<16x64xf32>
    %2 = tpu.matmul %0, %1, %cst {dimension_numbers = #tpu.dot_dimension_numbers<[1], [0], [0], [1], [0, 0, 1, 1], [], []>} : vector<16x32xbf16>, vector<32x64xbf16>, vector<16x64xf32> -> vector<16x64xf32>
    %c0_3 = arith.constant 0 : index
    %c0_4 = arith.constant 0 : index
    %3 = vector.load %arg3[%c0_3, %c0_4] : memref<1x64xf32, #tpu.memory_space<vmem>>, vector<1x64xf32>
    %4 = vector.broadcast %3 : vector<1x64xf32> to vector<16x64xf32>
    %5 = arith.addf %2, %4 : vector<16x64xf32>
    %cst_5 = arith.constant 0.000000e+00 : f32
    %6 = vector.broadcast %cst_5 : f32 to vector<16x64xf32>
    %7 = arith.maximumf %5, %6 : vector<16x64xf32>
    %8 = arith.truncf %7 : vector<16x64xf32> to vector<16x64xbf16>
    %c0_6 = arith.constant 0 : index
    %c0_7 = arith.constant 0 : index
    %9 = vector.load %arg4[%c0_6, %c0_7] : memref<64x32xbf16, #tpu.memory_space<vmem>>, vector<64x32xbf16>
    %cst_8 = arith.constant dense<0.000000e+00> : vector<16x32xf32>
    %10 = tpu.matmul %8, %9, %cst_8 {dimension_numbers = #tpu.dot_dimension_numbers<[1], [0], [0], [1], [0, 0, 1, 1], [], []>} : vector<16x64xbf16>, vector<64x32xbf16>, vector<16x32xf32> -> vector<16x32xf32>
    %c0_9 = arith.constant 0 : index
    %c0_10 = arith.constant 0 : index
    %11 = vector.load %arg5[%c0_9, %c0_10] : memref<1x32xf32, #tpu.memory_space<vmem>>, vector<1x32xf32>
    %12 = vector.broadcast %11 : vector<1x32xf32> to vector<16x32xf32>
    %13 = arith.addf %10, %12 : vector<16x32xf32>
    %cst_11 = arith.constant 0.000000e+00 : f32
    %14 = vector.broadcast %cst_11 : f32 to vector<16x32xf32>
    %15 = arith.maximumf %13, %14 : vector<16x32xf32>
    %16 = arith.truncf %15 : vector<16x32xf32> to vector<16x32xbf16>
    %c0_12 = arith.constant 0 : index
    %c0_13 = arith.constant 0 : index
    %17 = vector.load %arg6[%c0_12, %c0_13] : memref<32x16xbf16, #tpu.memory_space<vmem>>, vector<32x16xbf16>
    %cst_14 = arith.constant dense<0.000000e+00> : vector<16x16xf32>
    %18 = tpu.matmul %16, %17, %cst_14 {dimension_numbers = #tpu.dot_dimension_numbers<[1], [0], [0], [1], [0, 0, 1, 1], [], []>} : vector<16x32xbf16>, vector<32x16xbf16>, vector<16x16xf32> -> vector<16x16xf32>
    %c0_15 = arith.constant 0 : index
    %c0_16 = arith.constant 0 : index
    %19 = vector.load %arg7[%c0_15, %c0_16] : memref<1x16xf32, #tpu.memory_space<vmem>>, vector<1x16xf32>
    %20 = vector.broadcast %19 : vector<1x16xf32> to vector<16x16xf32>
    %21 = arith.addf %18, %20 : vector<16x16xf32>
    %cst_17 = arith.constant 0.000000e+00 : f32
    %22 = vector.broadcast %cst_17 : f32 to vector<16x16xf32>
    %23 = arith.maximumf %21, %22 : vector<16x16xf32>
    %24 = arith.truncf %23 : vector<16x16xf32> to vector<16x16xbf16>
    %c0_18 = arith.constant 0 : index
    %c0_19 = arith.constant 0 : index
    %25 = vector.load %arg8[%c0_18, %c0_19] : memref<16x128xbf16, #tpu.memory_space<vmem>>, vector<16x128xbf16>
    %cst_20 = arith.constant dense<0.000000e+00> : vector<16x128xf32>
    %26 = tpu.matmul %24, %25, %cst_20 {dimension_numbers = #tpu.dot_dimension_numbers<[1], [0], [0], [1], [0, 0, 1, 1], [], []>} : vector<16x16xbf16>, vector<16x128xbf16>, vector<16x128xf32> -> vector<16x128xf32>
    %c0_21 = arith.constant 0 : index
    %c0_22 = arith.constant 0 : index
    %27 = vector.load %arg9[%c0_21, %c0_22] : memref<1x128xf32, #tpu.memory_space<vmem>>, vector<1x128xf32>
    %28 = vector.broadcast %27 : vector<1x128xf32> to vector<16x128xf32>
    %29 = arith.addf %26, %28 : vector<16x128xf32>
    %cst_23 = arith.constant 0.000000e+00 : f32
    %30 = vector.broadcast %cst_23 : f32 to vector<16x128xf32>
    %31 = arith.subf %30, %29 : vector<16x128xf32>
    %32 = math.exp %31 : vector<16x128xf32>
    %cst_24 = arith.constant 1.000000e+00 : f32
    %33 = vector.broadcast %cst_24 : f32 to vector<16x128xf32>
    %34 = arith.addf %33, %32 : vector<16x128xf32>
    %35 = tpu.reciprocal %34 {approx = true} : vector<16x128xf32> -> vector<16x128xf32>
    %c0_25 = arith.constant 0 : index
    %c0_26 = arith.constant 0 : index
    %36 = vector.load %arg10[%c0_25, %c0_26] : memref<16x128xf32, #tpu.memory_space<vmem>>, vector<16x128xf32>
    tpu.vector_store %arg10[%c0_25, %c0_26], %35 {strides = array<i32>} : memref<16x128xf32, #tpu.memory_space<vmem>>, vector<16x128xf32>,
    return
  }
  func.func @transform_0(%arg0: i32) -> (i32, i32) {
    %c0_i32 = arith.constant 0 : i32
    %c0_i32_0 = arith.constant 0 : i32
    return %arg0, %c0_i32 : i32, i32
  }
  func.func @transform_1(%arg0: i32) -> (i32, i32) {
    %c0_i32 = arith.constant 0 : i32
    %c0_i32_0 = arith.constant 0 : i32
    %c0_i32_1 = arith.constant 0 : i32
    return %c0_i32, %c0_i32_0 : i32, i32
  }
  func.func @transform_2(%arg0: i32) -> (i32, i32) {
    %c0_i32 = arith.constant 0 : i32
    %c0_i32_0 = arith.constant 0 : i32
    %c0_i32_1 = arith.constant 0 : i32
    return %c0_i32, %c0_i32_0 : i32, i32
  }
  func.func @transform_3(%arg0: i32) -> (i32, i32) {
    %c0_i32 = arith.constant 0 : i32
    %c0_i32_0 = arith.constant 0 : i32
    %c0_i32_1 = arith.constant 0 : i32
    return %c0_i32, %c0_i32_0 : i32, i32
  }
  func.func @transform_4(%arg0: i32) -> (i32, i32) {
    %c0_i32 = arith.constant 0 : i32
    %c0_i32_0 = arith.constant 0 : i32
    %c0_i32_1 = arith.constant 0 : i32
    return %c0_i32, %c0_i32_0 : i32, i32
  }
  func.func @transform_5(%arg0: i32) -> (i32, i32) {
    %c0_i32 = arith.constant 0 : i32
    %c0_i32_0 = arith.constant 0 : i32
    %c0_i32_1 = arith.constant 0 : i32
    return %c0_i32, %c0_i32_0 : i32, i32
  }
  func.func @transform_6(%arg0: i32) -> (i32, i32) {
    %c0_i32 = arith.constant 0 : i32
    %c0_i32_0 = arith.constant 0 : i32
    %c0_i32_1 = arith.constant 0 : i32
    return %c0_i32, %c0_i32_0 : i32, i32
  }
  func.func @transform_7(%arg0: i32) -> (i32, i32) {
    %c0_i32 = arith.constant 0 : i32
    %c0_i32_0 = arith.constant 0 : i32
    %c0_i32_1 = arith.constant 0 : i32
    return %c0_i32, %c0_i32_0 : i32, i32
  }
  func.func @transform_8(%arg0: i32) -> (i32, i32) {
    %c0_i32 = arith.constant 0 : i32
    %c0_i32_0 = arith.constant 0 : i32
    %c0_i32_1 = arith.constant 0 : i32
    return %c0_i32, %c0_i32_0 : i32, i32
  }
  func.func @transform_9(%arg0: i32) -> (i32, i32) {
    %c0_i32 = arith.constant 0 : i32
    %c0_i32_0 = arith.constant 0 : i32
    return %arg0, %c0_i32 : i32, i32
  }
}

</mosaic_0001>

<bundles_post_ra>
// kernel: tpu_custom_call.1
= control target key start
LH: loop header
LB: loop body
LE: loop exit
PB: predicated region body
PF: predicated region fallthrough
CT: control target
= control target key end

     0   :  { %v469_v1 = vmov 0.0   ;;  %vm470_vm0 = vmmov 0   ;;  %vm64_vm1 = vcmask 261120   ;;  %s584_s0 = inlined_call_operand.vmem [shape: bf16[16,32], index: 0, kind: input, shape index: {}]   ;;  %s585_s1 = inlined_call_operand.vmem [shape: bf16[32,64], index: 1, kind: input, shape index: {}]   ;;  %s586_s2 = inlined_call_operand.vmem [shape: f32[1,64], index: 2, kind: input, shape index: {}]   ;;  %s587_s3 = inlined_call_operand.vmem [shape: bf16[64,32], index: 3, kind: input, shape index: {}]   ;;  %s588_s4 = inlined_call_operand.vmem [shape: f32[1,32], index: 4, kind: input, shape index: {}]   ;;  %s589_s5 = inlined_call_operand.vmem [shape: bf16[32,16], index: 5, kind: input, shape index: {}]   ;;  %s590_s6 = inlined_call_operand.vmem [shape: f32[1,16], index: 6, kind: input, shape index: {}]   ;;  %s591_s7 = inlined_call_operand.vmem [shape: bf16[16,128], index: 7, kind: input, shape index: {}]   ;;  %s592_s8 = inlined_call_operand.vmem [shape: f32[1,128], index: 8, kind: input, shape index: {}]   ;;  %s593_s9 = inlined_call_operand.hbm [shape: f32[16,128], index: 9, kind: output, shape index: {}]  }
   0x1   :  { %v427_v0 = vld [vmem:[%s585_s1] sm:$0xff]   ;;  %388 = vmatprep.subr.bf16.mxu0 %v469_v1  ;;  %396 = vmatprep.subr.bf16.mxu1 %v469_v1  ;;  %v428_v2 = vld [vmem:[%s585_s1 + $0x8] sm:$0xff]  }
   0x2   :  { %389 = vmatpush3.bf16.msra.mxu0 %v427_v0  ;;  %392 = vmatprep.mubr.msk.bf16.mxu0 %vm470_vm0, %v469_v1  ;;  %v430_v3 = vld [vmem:[%s587_s3] sm:$0xff]   ;;  %v431_v5 = vld [vmem:[%s587_s3 + $0x8] sm:$0xff]  }
   0x3   :  { %390 = vmatprep.subr.bf16.mxu0 %v469_v1  ;;  %404 = vmatprep.mubr.msk.bf16.mxu1 %vm470_vm0, %v469_v1  ;;  %v429_v4 = vld [vmem:[%s584_s0] sm:$0xff]  }
   0x4   :  { %397 = vmatpush3.bf16.msra.mxu1 %v430_v3 }
   0x5   :  { %398 = vmatprep.subr.bf16.mxu1 %v469_v1 }
   0x6   :  { %391 = vmatpush3.bf16.msra.mxu0 %v428_v2 }
   0x7   :  { %408 = vmatprep.subr.bf16.mxu0 %v469_v1 }
   0x8   :  { %14 = vsyncpa [#allocation3], 0  ;;  %399 = vmatpush3.bf16.msra.mxu1 %v431_v5  ;;  %v432_v6 = vld [vmem:[%s587_s3 + $0x10] sm:$0xff]   ;;  %v433_v7 = vld [vmem:[%s587_s3 + $0x18] sm:$0xff]   ;;  %vm151_vm2 = vcmask 523264   ;;  %vm284_vm3 = vcmask 130048  }
   0x9   :  { %393 = vmatmul.mubr.msk.bf16.vlgmr.msra.gmra.mrb[0].mxu0 %vm64_vm1, %v429_v4  ;;  %400 = vmatprep.subr.bf16.mxu1 %v469_v1  ;;  %v357_v8 = vld [vmem:[%s586_s2] ss:$0 sm:$0xff]  ;;  %v435_v19 = vld [vmem:[%s589_s5 + $0x8] sm:$0xff]  }
   0xa   :  { %412 = vmatprep.mubr.msk.bf16.mxu0 %vm470_vm0, %v469_v1  ;;  %v434_v18 = vld [vmem:[%s589_s5] sm:$0xff]  }
   0xb   :  { %409 = vmatpush3.bf16.msra.mxu0 %v434_v18  ;;  %v362_v20 = vld [vmem:[%s588_s4] ss:$0 sm:$0xff] }
   0xc   :  { %401 = vmatpush3.bf16.msra.mxu1 %v432_v6  ;;  %410 = vmatprep.subr.bf16.mxu0 %v469_v1  ;;  %v436_v30 = vld [vmem:[%s591_s7] sm:$0xff]  }
   0xd   :  { %402 = vmatprep.subr.bf16.mxu1 %v469_v1  ;;  %v368_v31 = vld [vmem:[%s590_s6] ss:$0 sm:$0xff]  ;;  %s471_s6 = smov [#allocation2]  }
   0xe   :  { %v372_v41 = vld [vmem:[%s592_s8] ss:$0 sm:$0xff]  ;;  %s346_s7 = sshll.u32 %s471_s6, 4  ;;  %s347_s7 = int_to_ptr.vmem [resolvable:$true] %s346_s7 }
   0xf   :  { %411 = vmatpush3.bf16.msra.mxu0 %v435_v19  ;;  %s445_s8 = scalar_lea.vmem %s347_s7, 256  ;;  %p450_p1 = scmp.lt.s32.totalorder %s347_s7, %s347_s7 }
  0x10   :  { %403 = vmatpush3.bf16.msra.mxu1 %v433_v7  ;;  %416 = vmatprep.subr.bf16.mxu0 %v469_v1  ;;  %p446_p0 = scmp.ne.s32.totalorder %s347_s7, %s445_s8  ;;  %p451_p2 = scmp.lt.s32.totalorder %s445_s8, %s445_s8 }
  0x12   :  { %p452_p3 = por %p451_p2, %p450_p1 }
  0x14   :  { %p453_p4 = pnand %p452_p3, %p446_p0 }
  0xdc   :  { %v102_v9 = vpop.f32.mrb[0].mxu0 }
  0xdd   :  { %v103_v10 = vadd.f32 %v357_v8, %v102_v9  ;;  %v394_v11 = vpop.f32.mrb[1].mxu0 }
  0xde   :  { %v105_v12 = vpop.f32.mrb[2].mxu0 }
  0xdf   :  { %v106_v13 = vadd.f32 %v357_v8, %v105_v12  ;;  %v395_v14 = vpop.f32.mrb[3].mxu0  ;;  %v109_v15 = vmax.f32 %v103_v10, 0.0 }
  0xe1   :  { %v110_v16 = vmax.f32 %v106_v13, 0.0 }
  0xe3   :  { %v111_v17 = vpack.c.bf16 %v110_v16, %v109_v15 }
  0xe5   :  { %405 = vmatmul.mubr.msk.bf16.vlgmr.msra.gmra.mrb[0].mxu1 %vm151_vm2, %v111_v17 }
 0x1b8   :  { %v189_v21 = vpop.f32.mrb[0].mxu1 }
 0x1b9   :  { %v190_v22 = vadd.f32 %v362_v20, %v189_v21  ;;  %v406_v23 = vpop.f32.mrb[1].mxu1 }
 0x1ba   :  { %v192_v24 = vpop.f32.mrb[2].mxu1 }
 0x1bb   :  { %v193_v25 = vadd.f32 %v362_v20, %v192_v24  ;;  %v407_v26 = vpop.f32.mrb[3].mxu1  ;;  %v196_v27 = vmax.f32 %v190_v22, 0.0 }
 0x1bd   :  { %v197_v28 = vmax.f32 %v193_v25, 0.0 }
 0x1bf   :  { %v198_v29 = vpack.c.bf16 %v197_v28, %v196_v27 }
 0x1c1   :  { %413 = vmatmul.mubr.msk.bf16.vlgmr.msra.gmra.mrb[4].mxu0 %vm64_vm1, %v198_v29 }
 0x1c2   :  { %418 = vmatprep.mubr.msk.bf16.mxu0 %vm470_vm0, %v469_v1  ;;  %417 = vmatpush3.bf16.msra.mxu0 %v436_v30 }
 0x294   :  { %v259_v32 = vpop.f32.mrb[4].mxu0 }
 0x295   :  { %v260_v33 = vadd.f32 %v368_v31, %v259_v32  ;;  %v414_v34 = vpop.f32.mrb[5].mxu0 }
 0x296   :  { %v262_v35 = vpop.f32.mrb[6].mxu0 }
 0x297   :  { %v263_v36 = vadd.f32 %v368_v31, %v262_v35  ;;  %v415_v37 = vpop.f32.mrb[7].mxu0  ;;  %v266_v38 = vmax.f32 %v260_v33, 0.0 }
 0x299   :  { %v267_v39 = vmax.f32 %v263_v36, 0.0 }
 0x29b   :  { %v268_v40 = vpack.c.bf16 %v267_v39, %v266_v38 }
 0x29d   :  { %419 = vmatmul.mubr.msk.bf16.vlgmr.msra.gmra.mrb[8].mxu0 %vm284_vm3, %v268_v40 }
 0x370   :  { %v322_v42 = vpop.f32.mrb[8].mxu0 }
 0x371   :  { %v323_v43 = vadd.f32 %v372_v41, %v322_v42  ;;  %v420_v44 = vpop.f32.mrb[9].mxu0 }
 0x372   :  { %v325_v45 = vpop.f32.mrb[10].mxu0 }
 0x373   :  { %v329_v46 = vsub.f32 0.0, %v323_v43  ;;  %v326_v47 = vadd.f32 %v372_v41, %v325_v45  ;;  %v421_v48 = vpop.f32.mrb[11].mxu0 }
 0x375   :  { %v331_v49 = vmul.f32 1.442695, %v329_v46  ;;  %v330_v50 = vsub.f32 0.0, %v326_v47 }
 0x377   :  { %437 = vpow2.f32 %v331_v49  ;;  %v333_v51 = vmul.f32 1.442695, %v330_v50 }
 0x379   :  { %439 = vpow2.f32 %v333_v51 }
 0x381   :  { %v438_v52 = vpop.eup %437 }
 0x382   :  { %v335_v53 = vadd.f32 1.0, %v438_v52 }
 0x383   :  { %v440_v54 = vpop.eup %439 }
 0x384   :  { %441 = vrcp.f32 %v335_v53  ;;  %v336_v55 = vadd.f32 1.0, %v440_v54 }
 0x386   :  { %443 = vrcp.f32 %v336_v55 }
 0x38e   :  { %v442_v56 = vpop.eup %441 }
 0x38f   :  { %339 = vst [vmem:[#allocation2] sm:$0xff] %v442_v56 }
 0x390   :  { %v444_v57 = vpop.eup %443 }
 0x391   :  { %340 = vst [vmem:[#allocation2 + $0x8] sm:$0xff] %v444_v57 }
 0x392   :  { %456 = shalt.err (!%p453_p4)
}
 0x393   :  { %s457_s12 = scalar_lea.hbm %s593_s9, 256 }
 0x394   :  { %p458_p5 = scmp.ne.s32.totalorder %s593_s9, %s457_s12  ;;  %p461_p6 = scmp.lt.u32.totalorder %s457_s12, %s593_s9 }
 0x396   :  { %p463_p7 = pnand %p461_p6, %p458_p5 }
 0x398   :  { %466 = shalt.err (!%p463_p7)
}
 0x399   :  { %s472_s17 = smov 128   ;;  %s473_s18 = smov 8  }
 0x39a   :  { %352 = dma.vmem_to_hbm [thread:$0]  %s347_s7, 256, %s593_s9, [#allocation3], %s472_s17, %s472_s17, %s473_s18  }
 0x39b   :  { %467 = dma.done.wait [#allocation3], 256  }
 0x39c   :  { %468 = vsyncadd [#allocation3], 4294967040 }
 0x39d   :  { %356 = vsyncpa [#allocation3], 1 }

</bundles_post_ra>
